<compile_context>
chip_gen: v6e
topology: v6e:2x2x1
jax: 0.10.0
libtpu: 0.0.40
codegen_flags: <defaults>
</compile_context>

<pallas_src>
import functools

import jax
import jax.numpy as jnp
from jax import lax
from jax.experimental import pallas as pl
from jax.experimental.pallas import tpu as pltpu

_EPS = 1e-5          # PyTorch nn.LayerNorm default
_LANE = 128
_MIB = 1024 * 1024


def _cdiv(a, b):
    return -(-a // b)


def _round_up(x, m):
    return ((x + m - 1) // m) * m


def _row_multiple(dtype):
    # Sublane packing: an f32 vreg is [8,128], bf16 [16,128], int8/fp8 [32,128].
    itemsize = jnp.dtype(dtype).itemsize
    if itemsize >= 4:
        return 8
    if itemsize == 2:
        return 16
    return 32


def _tpu_vmem_bytes():
    try:
        return int(pltpu.get_tpu_info().vmem_capacity_bytes)
    except Exception:
        return 64 * _MIB          # conservative (v7x-sized) fallback


_PHYS_VMEM = _tpu_vmem_bytes()
if _PHYS_VMEM >= 128 * _MIB:                      # v5e / v6e: 128 MiB physical
    _VMEM_BUDGET = 96 * _MIB
    _VMEM_CAP = 110 * _MIB
    _TWO_CORE_CHIP = False
else:                                             # v7x-class: 64 MiB per TC
    _VMEM_BUDGET = max(24 * _MIB, int(_PHYS_VMEM * 0.62))
    _VMEM_CAP = max(32 * _MIB, int(_PHYS_VMEM * 0.875))
    _TWO_CORE_CHIP = True


def _compiler_params(est_bytes, dims):
    limit = min(_VMEM_CAP, max(int(est_bytes * 1.25), 16 * _MIB))
    return pltpu.CompilerParams(dimension_semantics=dims,
                                vmem_limit_bytes=limit)


def _maybe_pad_cols(a, cols):
    """Zero-pad the last dim of a 2D array; no-op (no HBM pass) if aligned."""
    if a.shape[-1] == cols:
        return a
    return jnp.pad(a, ((0, 0), (0, cols - a.shape[-1])))


# ===================== fused PreNorm(LayerNorm) + Linear =====================
def _fused_prenorm_linear_kernel(x_ref, g_ref, b_ref, w_ref, bias_ref, o_ref,
                                 xn_ref, *, inv_dim):
    # Normalize this row-tile ONCE (first output-column block) and cache the
    # result in VMEM scratch; every N tile of the same row block reuses it.
    # (j axis must stay sequential / "arbitrary" for this to hold.)
    @pl.when(pl.program_id(1) == 0)
    def _():
        x = x_ref[...].astype(jnp.float32)
        # One-pass statistics. Zero-padded lanes do not perturb the sums and
        # we divide by the TRUE feature dim, so padding is exact.
        s = jnp.sum(x, axis=-1, keepdims=True)
        ss = jnp.sum(x * x, axis=-1, keepdims=True)
        mean = s * inv_dim
        var = jnp.maximum(ss * inv_dim - mean * mean, 0.0)   # biased (torch)
        inv = lax.rsqrt(var + _EPS)
        y = (x - mean) * inv * g_ref[...].astype(jnp.float32) \
            + b_ref[...].astype(jnp.float32)
        xn_ref[...] = y.astype(xn_ref.dtype)

    acc = jnp.dot(xn_ref[...], w_ref[...], preferred_element_type=jnp.float32)
    o_ref[...] = (acc + bias_ref[...].astype(jnp.float32)).astype(o_ref.dtype)


def prenorm2_linear_fused(x, gamma, beta, w, b, *, tm=512, tn=512):
    """fn(LayerNorm(x)) with fn = Linear(w, b), as one fused Pallas kernel."""
    orig_shape = x.shape
    d_in = orig_shape[-1]
    d_out = w.shape[1]
    x2 = x.reshape(-1, d_in)
    rows = x2.shape[0]

    row_mult = _row_multiple(x.dtype)
    d_in_p = _round_up(d_in, _LANE)
    n_p = _round_up(d_out, _LANE)

    tm_full = min(tm, _round_up(rows, row_mult))
    tn = min(tn, n_p)
    tm = tm_full

    x_bytes = jnp.dtype(x.dtype).itemsize
    w_bytes = jnp.dtype(w.dtype).itemsize

    def est(tm_, tn_):
        return (2 * tm_ * d_in_p * x_bytes          # x tile (double buffered)
                + 4 * d_in_p * 4                    # gamma + beta
                + 2 * d_in_p * tn_ * w_bytes        # w tile
                + 2 * tn_ * 4                       # bias tile
                + 2 * tm_ * tn_ * x_bytes           # out tile
                + tm_ * tn_ * 4                     # f32 dot temporary
                + tm_ * d_in_p * x_bytes)           # normalized-x scratch

    # Shrink tn FIRST (weight re-fetch across row blocks scales with rows/tm,
    # so tm is the traffic lever), then tm only if still over budget.
    while est(tm, tn) > _VMEM_BUDGET and tn > _LANE:
        tn = max(_LANE, _round_up(tn // 2, _LANE))
    while est(tm, tn) > _VMEM_BUDGET and tm > row_mult:
        tm = max(row_mult, _round_up(tm // 2, row_mult))

    # If the full-d_in fused layout collapses the tiles (huge d_in vs VMEM),
    # the K-tiled LayerNorm + matmul pair keeps big MXU tiles instead.
    if est(tm, tn) > _VMEM_BUDGET or (tm_full >= 128 and tm < 128):
        return linear_pallas(layer_norm_pallas(x, gamma, beta), w, b)

    # v7x-class chips have 2 TensorCores; give the parallel row axis >=2
    # blocks when there is enough work so neither core idles.
    if _TWO_CORE_CHIP and rows >= 512 and _cdiv(rows, tm) < 2:
        tm = _round_up(_cdiv(rows, 2), row_mult)

    # Feature-dim zero padding only when not lane-aligned (exactness of LN
    # stats / K contraction); no row padding (ragged edge blocks instead).
    xp = _maybe_pad_cols(x2, d_in_p)
    gp = _maybe_pad_cols(gamma.reshape(1, d_in), d_in_p)
    bp = _maybe_pad_cols(beta.reshape(1, d_in), d_in_p)
    wp = w
    if d_in_p != d_in or n_p != d_out:
        wp = jnp.pad(w, ((0, d_in_p - d_in), (0, n_p - d_out)))
    biasp = _maybe_pad_cols(b.reshape(1, d_out), n_p)

    grid = (_cdiv(rows, tm), _cdiv(n_p, tn))
    out = pl.pallas_call(
        functools.partial(_fused_prenorm_linear_kernel, inv_dim=1.0 / d_in),
        out_shape=jax.ShapeDtypeStruct((rows, n_p), x.dtype),
        grid=grid,
        in_specs=[
            pl.BlockSpec((tm, d_in_p), lambda i, j: (i, 0)),
            pl.BlockSpec((1, d_in_p), lambda i, j: (0, 0)),
            pl.BlockSpec((1, d_in_p), lambda i, j: (0, 0)),
            pl.BlockSpec((d_in_p, tn), lambda i, j: (0, j)),
            pl.BlockSpec((1, tn), lambda i, j: (0, j)),
        ],
        out_specs=pl.BlockSpec((tm, tn), lambda i, j: (i, j)),
        scratch_shapes=[pltpu.VMEM((tm, d_in_p), x.dtype)],
        # j must stay "arbitrary": the LN scratch is carried across N tiles.
        compiler_params=_compiler_params(est(tm, tn), ("parallel", "arbitrary")),
    )(xp, gp, bp, wp, biasp)

    if n_p != d_out:
        out = out[:, :d_out]
    return out.reshape(orig_shape[:-1] + (d_out,))


# ----------------------------- LayerNorm kernel ------------------------------
def _layernorm_kernel(x_ref, g_ref, b_ref, o_ref, *, inv_dim):
    x = x_ref[...].astype(jnp.float32)
    s = jnp.sum(x, axis=-1, keepdims=True)
    ss = jnp.sum(x * x, axis=-1, keepdims=True)
    mean = s * inv_dim
    var = jnp.maximum(ss * inv_dim - mean * mean, 0.0)
    inv = lax.rsqrt(var + _EPS)
    y = (x - mean) * inv * g_ref[...].astype(jnp.float32) \
        + b_ref[...].astype(jnp.float32)
    o_ref[...] = y.astype(o_ref.dtype)


def layer_norm_pallas(x, gamma, beta, *, block_rows=1024):
    """LayerNorm over the last axis of x (any leading shape)."""
    orig_shape = x.shape
    dim = orig_shape[-1]
    x2 = x.reshape(-1, dim)
    rows = x2.shape[0]

    row_mult = _row_multiple(x.dtype)
    dim_p = _round_up(dim, _LANE)
    itemsize = jnp.dtype(x.dtype).itemsize

    block_rows = min(block_rows, _round_up(rows, row_mult))
    # x tile + out tile, each double-buffered.
    while (4 * block_rows * dim_p * itemsize > _VMEM_BUDGET
           and block_rows > row_mult):
        block_rows = max(row_mult, _round_up(block_rows // 2, row_mult))

    xp = _maybe_pad_cols(x2, dim_p)          # zero-pad ONLY if dim % 128 != 0
    gp = _maybe_pad_cols(gamma.reshape(1, dim), dim_p)
    bp = _maybe_pad_cols(beta.reshape(1, dim), dim_p)

    est = 4 * block_rows * dim_p * itemsize + 4 * dim_p * 4
    out = pl.pallas_call(
        functools.partial(_layernorm_kernel, inv_dim=1.0 / dim),
        out_shape=jax.ShapeDtypeStruct((rows, dim_p), x.dtype),
        grid=(_cdiv(rows, block_rows),),
        in_specs=[
            pl.BlockSpec((block_rows, dim_p), lambda i: (i, 0)),
            pl.BlockSpec((1, dim_p), lambda i: (0, 0)),
            pl.BlockSpec((1, dim_p), lambda i: (0, 0)),
        ],
        out_specs=pl.BlockSpec((block_rows, dim_p), lambda i: (i, 0)),
        compiler_params=_compiler_params(est, ("parallel",)),
    )(xp, gp, bp)
    if dim_p != dim:
        out = out[:, :dim]
    return out.reshape(orig_shape)


# --------------------------- example `fn`: Linear ----------------------------
def _linear_kernel(x_ref, w_ref, b_ref, o_ref, acc_ref):
    @pl.when(pl.program_id(2) == 0)
    def _():
        acc_ref[...] = jnp.zeros_like(acc_ref)

    acc_ref[...] += jnp.dot(x_ref[...], w_ref[...],
                            preferred_element_type=jnp.float32)

    @pl.when(pl.program_id(2) == pl.num_programs(2) - 1)
    def _():
        o_ref[...] = (acc_ref[...] + b_ref[...].astype(jnp.float32)
                      ).astype(o_ref.dtype)


def linear_pallas(x, w, b, *, tm=512, tn=512, tk=None):
    """y = x @ w + b, tiled (M, N, K) matmul with f32 accumulator."""
    orig_shape = x.shape
    d_in = orig_shape[-1]
    d_out = w.shape[1]
    x2 = x.reshape(-1, d_in)
    rows = x2.shape[0]

    x_bytes = jnp.dtype(x.dtype).itemsize
    w_bytes = jnp.dtype(w.dtype).itemsize
    row_mult = _row_multiple(x.dtype)
    if tk is None:
        tk = 2048 if x_bytes <= 2 else 1024

    d_in_p = _round_up(d_in, _LANE)
    n_p = _round_up(d_out, _LANE)
    tm = min(tm, _round_up(rows, row_mult))
    tn = min(tn, n_p)
    tk = min(tk, d_in_p)

    def est(tm_, tn_, tk_):
        return (2 * tm_ * tk_ * x_bytes + 2 * tk_ * tn_ * w_bytes
                + 2 * tn_ * 4 + 2 * tm_ * tn_ * x_bytes + tm_ * tn_ * 4)

    while est(tm, tn, tk) > _VMEM_BUDGET and tk > _LANE:
        tk = max(_LANE, _round_up(tk // 2, _LANE))
    while est(tm, tn, tk) > _VMEM_BUDGET and tn > _LANE:
        tn = max(_LANE, _round_up(tn // 2, _LANE))
    while est(tm, tn, tk) > _VMEM_BUDGET and tm > row_mult:
        tm = max(row_mult, _round_up(tm // 2, row_mult))

    # K must be fully zero-padded (garbage lanes would contaminate the dot);
    # skipped entirely when d_in is already a clean multiple of tk/128.
    k_p = _round_up(d_in_p, tk)
    xp = _maybe_pad_cols(x2, k_p)
    wp = w
    if k_p != d_in or n_p != d_out:
        wp = jnp.pad(w, ((0, k_p - d_in), (0, n_p - d_out)))
    biasp = _maybe_pad_cols(b.reshape(1, d_out), n_p)

    grid = (_cdiv(rows, tm), _cdiv(n_p, tn), k_p // tk)
    out = pl.pallas_call(
        _linear_kernel,
        out_shape=jax.ShapeDtypeStruct((rows, n_p), x.dtype),
        grid=grid,
        in_specs=[
            pl.BlockSpec((tm, tk), lambda i, j, k: (i, k)),
            pl.BlockSpec((tk, tn), lambda i, j, k: (k, j)),
            pl.BlockSpec((1, tn), lambda i, j, k: (0, j)),
        ],
        out_specs=pl.BlockSpec((tm, tn), lambda i, j, k: (i, j)),
        scratch_shapes=[pltpu.VMEM((tm, tn), jnp.float32)],
        compiler_params=_compiler_params(
            est(tm, tn, tk), ("parallel", "parallel", "arbitrary")),
    )(xp, wp, biasp)

    if n_p != d_out:
        out = out[:, :d_out]
    return out.reshape(orig_shape[:-1] + (d_out,))


# --------------------------------- PreNorm2 ----------------------------------
def prenorm2(x, gamma, beta, fn, **kwargs):
    """Generic PreNorm2.forward: fn(LayerNorm(x), **kwargs) for arbitrary fn."""
    # TODO(synk): arbitrary Python `fn` cannot be fused; only the Linear case
    # has a fused kernel (prenorm2_linear_fused).
    return fn(layer_norm_pallas(x, gamma, beta), **kwargs)


if __name__ == "__main__":
    # Small shapes implied by a transformer-style PreNorm block.
    batch, seq, dim = 2, 8, 32

    key = jax.random.PRNGKey(0)
    kx, kg, kb, kw, kbias = jax.random.split(key, 5)

    x = jax.random.normal(kx, (batch, seq, dim), dtype=jnp.float32)
    gamma = 1.0 + 0.1 * jax.random.normal(kg, (dim,), dtype=jnp.float32)
    beta = 0.1 * jax.random.normal(kb, (dim,), dtype=jnp.float32)

    # Example wrapped fn: a Linear(dim -> dim).
    w = jax.random.normal(kw, (dim, dim), dtype=jnp.float32) / jnp.sqrt(dim)
    bias = 0.01 * jax.random.normal(kbias, (dim,), dtype=jnp.float32)

    # 1) Fused PreNorm + Linear (preferred path).
    out_fused = prenorm2_linear_fused(x, gamma, beta, w, bias)
    # 2) Generic path (LN kernel, then tiled Linear kernel as `fn`).
    fn = functools.partial(linear_pallas, w=w, b=bias)
    out_generic = prenorm2(x, gamma, beta, fn)
    out_fused, out_generic = jax.block_until_ready((out_fused, out_generic))

    # Pure-JAX reference of the full forward.
    mean = jnp.mean(x, axis=-1, keepdims=True)
    var = jnp.mean((x - mean) ** 2, axis=-1, keepdims=True)
    ref_norm = (x - mean) * lax.rsqrt(var + _EPS) * gamma + beta
    ref = ref_norm @ w + bias

    assert out_fused.shape == (batch, seq, dim)
    assert out_generic.shape == (batch, seq, dim)
    assert jnp.allclose(out_fused, ref, atol=1e-4, rtol=1e-4)
    assert jnp.allclose(out_generic, ref, atol=1e-4, rtol=1e-4)

    print("KERNEL_OK")
</pallas_src>

<mosaic_0001>
module attributes {stable_mosaic.version = 11 : i64} {
  func.func @_fused_prenorm_linear_kernel(%arg0: i32, %arg1: i32, %arg2: memref<16x128xf32, #tpu.memory_space<vmem>>, %arg3: memref<1x128xf32, #tpu.memory_space<vmem>>, %arg4: memref<1x128xf32, #tpu.memory_space<vmem>>, %arg5: memref<128x128xf32, #tpu.memory_space<vmem>>, %arg6: memref<1x128xf32, #tpu.memory_space<vmem>>, %arg7: memref<16x128xf32, #tpu.memory_space<vmem>>, %arg8: memref<16x128xf32, #tpu.memory_space<vmem>>) attributes {dimension_semantics = [#tpu.dimension_semantics<parallel>, #tpu.dimension_semantics<arbitrary>], iteration_bounds = array<i64: 1, 1>, scalar_prefetch = 0 : i64, scratch_operands = 1 : i64, tpu.core_type = #tpu.core_type<tc>, window_params = [{transform_indices = @transform_0, window_bounds = array<i64: 16, 128>}, {pipeline_mode = #tpu.pipeline_mode<synchronous>, transform_indices = @transform_1, window_bounds = array<i64: 1, 128>}, {pipeline_mode = #tpu.pipeline_mode<synchronous>, transform_indices = @transform_2, window_bounds = array<i64: 1, 128>}, {transform_indices = @transform_3, window_bounds = array<i64: 128, 128>}, {transform_indices = @transform_4, window_bounds = array<i64: 1, 128>}, {transform_indices = @transform_5, window_bounds = array<i64: 16, 128>}]} {
    %c0_i32 = arith.constant 0 : i32
    %0 = arith.cmpi eq, %arg1, %c0_i32 : i32
    %1 = arith.extui %0 : i1 to i32
    %c0_i32_0 = arith.constant 0 : i32
    %2 = arith.cmpi ne, %1, %c0_i32_0 : i32
    scf.if %2 {
      %c0_8 = arith.constant 0 : index
      %c0_9 = arith.constant 0 : index
      %10 = vector.load %arg2[%c0_8, %c0_9] : memref<16x128xf32, #tpu.memory_space<vmem>>, vector<16x128xf32>
      %cst_10 = arith.constant dense<0.000000e+00> : vector<16xf32>
      %11 = vector.multi_reduction <add>, %10, %cst_10 [1] : vector<16x128xf32> to vector<16xf32>
      %12 = vector.shape_cast %11 : vector<16xf32> to vector<16x1xf32>
      %13 = arith.mulf %10, %10 : vector<16x128xf32>
      %cst_11 = arith.constant dense<0.000000e+00> : vector<16xf32>
      %14 = vector.multi_reduction <add>, %13, %cst_11 [1] : vector<16x128xf32> to vector<16xf32>
      %15 = vector.shape_cast %14 : vector<16xf32> to vector<16x1xf32>
      %cst_12 = arith.constant 3.125000e-02 : f32
      %16 = vector.broadcast %cst_12 : f32 to vector<16x1xf32>
      %17 = arith.mulf %12, %16 : vector<16x1xf32>
      %cst_13 = arith.constant 3.125000e-02 : f32
      %18 = vector.broadcast %cst_13 : f32 to vector<16x1xf32>
      %19 = arith.mulf %15, %18 : vector<16x1xf32>
      %20 = arith.mulf %17, %17 : vector<16x1xf32>
      %21 = arith.subf %19, %20 : vector<16x1xf32>
      %cst_14 = arith.constant 0.000000e+00 : f32
      %22 = vector.broadcast %cst_14 : f32 to vector<16x1xf32>
      %23 = arith.maximumf %21, %22 : vector<16x1xf32>
      %cst_15 = arith.constant 9.99999974E-6 : f32
      %24 = vector.broadcast %cst_15 : f32 to vector<16x1xf32>
      %25 = arith.addf %23, %24 : vector<16x1xf32>
      %26 = math.rsqrt %25 : vector<16x1xf32>
      %27 = vector.broadcast %17 : vector<16x1xf32> to vector<16x128xf32>
      %28 = arith.subf %10, %27 : vector<16x128xf32>
      %29 = vector.broadcast %26 : vector<16x1xf32> to vector<16x128xf32>
      %30 = arith.mulf %28, %29 : vector<16x128xf32>
      %c0_16 = arith.constant 0 : index
      %c0_17 = arith.constant 0 : index
      %31 = vector.load %arg3[%c0_16, %c0_17] : memref<1x128xf32, #tpu.memory_space<vmem>>, vector<1x128xf32>
      %32 = vector.broadcast %31 : vector<1x128xf32> to vector<16x128xf32>
      %33 = arith.mulf %30, %32 : vector<16x128xf32>
      %c0_18 = arith.constant 0 : index
      %c0_19 = arith.constant 0 : index
      %34 = vector.load %arg4[%c0_18, %c0_19] : memref<1x128xf32, #tpu.memory_space<vmem>>, vector<1x128xf32>
      %35 = vector.broadcast %34 : vector<1x128xf32> to vector<16x128xf32>
      %36 = arith.addf %33, %35 : vector<16x128xf32>
      %c0_20 = arith.constant 0 : index
      %c0_21 = arith.constant 0 : index
      %37 = vector.load %arg8[%c0_20, %c0_21] : memref<16x128xf32, #tpu.memory_space<vmem>>, vector<16x128xf32>
      tpu.vector_store %arg8[%c0_20, %c0_21], %36 {strides = array<i32>} : memref<16x128xf32, #tpu.memory_space<vmem>>, vector<16x128xf32>,
    } else {
    }
    %c0 = arith.constant 0 : index
    %c0_1 = arith.constant 0 : index
    %3 = vector.load %arg8[%c0, %c0_1] : memref<16x128xf32, #tpu.memory_space<vmem>>, vector<16x128xf32>
    %c0_2 = arith.constant 0 : index
    %c0_3 = arith.constant 0 : index
    %4 = vector.load %arg5[%c0_2, %c0_3] : memref<128x128xf32, #tpu.memory_space<vmem>>, vector<128x128xf32>
    %cst = arith.constant dense<0.000000e+00> : vector<16x128xf32>
    %5 = tpu.matmul %3, %4, %cst {dimension_numbers = #tpu.dot_dimension_numbers<[1], [0], [0], [1], [0, 0, 1, 1], [], []>} : vector<16x128xf32>, vector<128x128xf32>, vector<16x128xf32> -> vector<16x128xf32>
    %c0_4 = arith.constant 0 : index
    %c0_5 = arith.constant 0 : index
    %6 = vector.load %arg6[%c0_4, %c0_5] : memref<1x128xf32, #tpu.memory_space<vmem>>, vector<1x128xf32>
    %7 = vector.broadcast %6 : vector<1x128xf32> to vector<16x128xf32>
    %8 = arith.addf %5, %7 : vector<16x128xf32>
    %c0_6 = arith.constant 0 : index
    %c0_7 = arith.constant 0 : index
    %9 = vector.load %arg7[%c0_6, %c0_7] : memref<16x128xf32, #tpu.memory_space<vmem>>, vector<16x128xf32>
    tpu.vector_store %arg7[%c0_6, %c0_7], %8 {strides = array<i32>} : memref<16x128xf32, #tpu.memory_space<vmem>>, vector<16x128xf32>,
    return
  }
  func.func @transform_0(%arg0: i32, %arg1: i32) -> (i32, i32) {
    %c0_i32 = arith.constant 0 : i32
    %c0_i32_0 = arith.constant 0 : i32
    return %arg0, %c0_i32 : i32, i32
  }
  func.func @transform_1(%arg0: i32, %arg1: i32) -> (i32, i32) {
    %c0_i32 = arith.constant 0 : i32
    %c0_i32_0 = arith.constant 0 : i32
    %c0_i32_1 = arith.constant 0 : i32
    return %c0_i32, %c0_i32_0 : i32, i32
  }
  func.func @transform_2(%arg0: i32, %arg1: i32) -> (i32, i32) {
    %c0_i32 = arith.constant 0 : i32
    %c0_i32_0 = arith.constant 0 : i32
    %c0_i32_1 = arith.constant 0 : i32
    return %c0_i32, %c0_i32_0 : i32, i32
  }
  func.func @transform_3(%arg0: i32, %arg1: i32) -> (i32, i32) {
    %c0_i32 = arith.constant 0 : i32
    %c0_i32_0 = arith.constant 0 : i32
    return %c0_i32, %arg1 : i32, i32
  }
  func.func @transform_4(%arg0: i32, %arg1: i32) -> (i32, i32) {
    %c0_i32 = arith.constant 0 : i32
    %c0_i32_0 = arith.constant 0 : i32
    return %c0_i32, %arg1 : i32, i32
  }
  func.func @transform_5(%arg0: i32, %arg1: i32) -> (i32, i32) {
    %c0_i32 = arith.constant 0 : i32
    return %arg0, %arg1 : i32, i32
  }
}

</mosaic_0001>

<bundles_post_ra>
// kernel: tpu_custom_call.1
= control target key start
LH: loop header
LB: loop body
LE: loop exit
PB: predicated region body
PF: predicated region fallthrough
CT: control target
= control target key end

     0   :  { %10 = vsyncpa [#allocation4], 0  ;;  %s428_s0 = inlined_call_operand.hbm [shape: f32[16,128], index: 0, kind: input, shape index: {}]   ;;  %s429_s1 = inlined_call_operand.vmem [shape: f32[1,128], index: 1, kind: input, shape index: {}]   ;;  %s430_s2 = inlined_call_operand.vmem [shape: f32[1,128], index: 2, kind: input, shape index: {}]   ;;  %s431_s3 = inlined_call_operand.hbm [shape: f32[128,128], index: 3, kind: input, shape index: {}]   ;;  %s432_s4 = inlined_call_operand.vmem [shape: f32[1,128], index: 4, kind: input, shape index: {}]   ;;  %s433_s5 = inlined_call_operand.hbm [shape: f32[16,128], index: 5, kind: output, shape index: {}]  }
   0x1   :  { %11 = vsyncpa [#allocation7], 0 }
   0x2   :  { %12 = vsyncpa [#allocation5], 0  ;;  %s354_s18 = smov [#allocation3]  }
   0x3   :  { %s18_s19 = sshll.u32 %s354_s18, 4  ;;  %s19_s19 = int_to_ptr.vmem [resolvable:$true] %s18_s19 }
   0x4   :  { %s296_s20 = scalar_lea.vmem %s19_s19, 256  ;;  %p301_p1 = scmp.lt.s32.totalorder %s19_s19, %s19_s19 }
   0x5   :  { %p297_p0 = scmp.ne.s32.totalorder %s19_s19, %s296_s20  ;;  %p302_p2 = scmp.lt.s32.totalorder %s296_s20, %s296_s20 }
   0x7   :  { %p303_p3 = por %p302_p2, %p301_p1 }
   0x9   :  { %p304_p4 = pnand %p303_p3, %p297_p0 }
   0xb   :  { %307 = shalt.err (!%p304_p4)
}
   0xc   :  { %s355_s21 = smov 128   ;;  %s356_s22 = smov 8  }
   0xd   :  { %24 = dma.hbm_to_vmem [thread:$0]  %s428_s0, 256, %s19_s19, [#allocation4], %s355_s21, %s355_s21, %s356_s22  }
   0xe   :  { %s357_s25 = smov [#allocation6]  }
   0xf   :  { %s34_s26 = sshll.u32 %s357_s25, 4  ;;  %s35_s26 = int_to_ptr.vmem [resolvable:$true] %s34_s26 }
  0x10   :  { %s316_s27 = scalar_lea.vmem %s35_s26, 2048  ;;  %p321_p6 = scmp.lt.s32.totalorder %s35_s26, %s35_s26 }
  0x11   :  { %p317_p5 = scmp.ne.s32.totalorder %s35_s26, %s316_s27  ;;  %p322_p7 = scmp.lt.s32.totalorder %s316_s27, %s316_s27 }
  0x13   :  { %p323_p8 = por %p322_p7, %p321_p6 }
  0x15   :  { %p324_p9 = pnand %p323_p8, %p317_p5 }
  0x17   :  { %327 = shalt.err (!%p324_p9)
}
  0x18   :  { %40 = dma.hbm_to_vmem [thread:$0]  %s431_s3, 2048, %s35_s26, [#allocation7], %s355_s21, %s355_s21, %s356_s22  }
  0x19   :  { %348 = dma.done.wait [#allocation4], 256  }
  0x1a   :  { %349 = vsyncadd [#allocation4], 4294967040 }
  0x1b   :  { %350 = dma.done.wait [#allocation7], 2048  }
  0x1c   :  { %351 = vsyncadd [#allocation7], 4294965248  ;;  %v401_v0 = vld [vmem:[#allocation3] sm:$0xff]  ;;  %v403_v1 = vld [vmem:[#allocation3 + $0x8] sm:$0xff] }
  0x1d   :  { %55 = vadd.xlane.f32.xlu0 %v401_v0  ;;  %v59_v2 = vmul.f32 %v401_v0, %v401_v0  ;;  %v60_v3 = vmul.f32 %v403_v1, %v403_v1  ;;  %v120_v4 = vld [vmem:[#allocation6 + $0x78] sm:$0xff]  ;;  %v119_v5 = vld [vmem:[#allocation6 + $0x70] sm:$0xff]  ;;  %v118_v6 = vld [vmem:[#allocation6 + $0x68] sm:$0xff] }
  0x1e   :  { %244 = vmatprep.subr.mxu0 %v120_v4  ;;  %v117_v7 = vld [vmem:[#allocation6 + $0x60] sm:$0xff]  ;;  %v116_v8 = vld [vmem:[#allocation6 + $0x58] sm:$0xff]  ;;  %v115_v9 = vld [vmem:[#allocation6 + $0x50] sm:$0xff] }
  0x1f   :  { %61 = vadd.xlane.f32.xlu1 %v59_v2  ;;  %245 = vmatpush3.msra.mxu0 %v120_v4  ;;  %v114_v10 = vld [vmem:[#allocation6 + $0x48] sm:$0xff]  ;;  %v113_v11 = vld [vmem:[#allocation6 + $0x40] sm:$0xff]  ;;  %v112_v12 = vld [vmem:[#allocation6 + $0x38] sm:$0xff] }
  0x20   :  { %246 = vmatprep.subr.mxu0 %v119_v5  ;;  %v111_v13 = vld [vmem:[#allocation6 + $0x30] sm:$0xff]  ;;  %v110_v14 = vld [vmem:[#allocation6 + $0x28] sm:$0xff]  ;;  %v109_v15 = vld [vmem:[#allocation6 + $0x20] sm:$0xff] }
  0x21   :  { %57 = vadd.xlane.f32.xlu0 %v403_v1  ;;  %247 = vmatpush3.msra.mxu0 %v119_v5  ;;  %v108_v16 = vld [vmem:[#allocation6 + $0x18] sm:$0xff]  ;;  %v107_v17 = vld [vmem:[#allocation6 + $0x10] sm:$0xff]  ;;  %v106_v18 = vld [vmem:[#allocation6 + $0x8] sm:$0xff] }
  0x22   :  { %248 = vmatprep.subr.mxu0 %v118_v6  ;;  %v105_v19 = vld [vmem:[#allocation6] sm:$0xff]  ;;  %v223_v38 = vld [vmem:[%s429_s1] ss:$0 sm:$0xff]  ;;  %s358_s1 = smov [#allocation8]  }
  0x23   :  { %63 = vadd.xlane.f32.xlu1 %v60_v3  ;;  %249 = vmatpush3.msra.mxu0 %v118_v6  ;;  %v224_v40 = vld [vmem:[%s430_s2] ss:$0 sm:$0xff]  ;;  %s210_s9 = sshll.u32 %s358_s1, 4  ;;  %s211_s9 = int_to_ptr.vmem [resolvable:$true] %s210_s9 }
  0x24   :  { %250 = vmatprep.subr.mxu0 %v117_v7  ;;  %v225_v48 = vld [vmem:[%s432_s4] ss:$0 sm:$0xff]  ;;  %s328_s2 = scalar_lea.vmem %s211_s9, 256  ;;  %p333_p11 = scmp.lt.s32.totalorder %s211_s9, %s211_s9 }
  0x25   :  { %251 = vmatpush3.msra.mxu0 %v117_v7  ;;  %p329_p10 = scmp.ne.s32.totalorder %s211_s9, %s328_s2  ;;  %p334_p12 = scmp.lt.s32.totalorder %s328_s2, %s328_s2 }
  0x26   :  { %252 = vmatprep.subr.mxu0 %v116_v8 }
  0x27   :  { %253 = vmatpush3.msra.mxu0 %v116_v8  ;;  %p335_p13 = por %p334_p12, %p333_p11 }
  0x28   :  { %254 = vmatprep.subr.mxu0 %v115_v9 }
  0x29   :  { %255 = vmatpush3.msra.mxu0 %v115_v9  ;;  %p336_p0 = pnand %p335_p13, %p329_p10 }
  0x2a   :  { %256 = vmatprep.subr.mxu0 %v114_v10 }
  0x2b   :  { %257 = vmatpush3.msra.mxu0 %v114_v10 }
  0x2c   :  { %258 = vmatprep.subr.mxu0 %v113_v11 }
  0x2d   :  { %259 = vmatpush3.msra.mxu0 %v113_v11 }
  0x2e   :  { %260 = vmatprep.subr.mxu0 %v112_v12 }
  0x2f   :  { %261 = vmatpush3.msra.mxu0 %v112_v12 }
  0x30   :  { %262 = vmatprep.subr.mxu0 %v111_v13 }
  0x31   :  { %263 = vmatpush3.msra.mxu0 %v111_v13 }
  0x32   :  { %264 = vmatprep.subr.mxu0 %v110_v14 }
  0x33   :  { %265 = vmatpush3.msra.mxu0 %v110_v14 }
  0x34   :  { %266 = vmatprep.subr.mxu0 %v109_v15 }
  0x35   :  { %267 = vmatpush3.msra.mxu0 %v109_v15 }
  0x36   :  { %268 = vmatprep.subr.mxu0 %v108_v16 }
  0x37   :  { %269 = vmatpush3.msra.mxu0 %v108_v16 }
  0x38   :  { %270 = vmatprep.subr.mxu0 %v107_v17 }
  0x39   :  { %271 = vmatpush3.msra.mxu0 %v107_v17 }
  0x3a   :  { %272 = vmatprep.subr.mxu0 %v106_v18 }
  0x3b   :  { %273 = vmatpush3.msra.mxu0 %v106_v18 }
  0x3c   :  { %274 = vmatprep.subr.mxu0 %v105_v19 }
  0x3d   :  { %275 = vmatpush3.msra.mxu0 %v105_v19 }
  0xa6   :  { %v56_v20 = vpop.xlane.xlu0 %55 }
  0xa7   :  { %v65_v21 = vmul.f32 0.03125, %v56_v20 }
  0xa8   :  { %v62_v22 = vpop.xlane.xlu1 %61 }
  0xa9   :  { %v69_v23 = vmul.f32 %v65_v21, %v65_v21  ;;  %v67_v24 = vmul.f32 0.03125, %v62_v22  ;;  %v79_v36 = vsub.f32 %v401_v0, %v65_v21 }
  0xaa   :  { %v58_v25 = vpop.xlane.xlu0 %57 }
  0xab   :  { %v71_v26 = vsub.f32 %v67_v24, %v69_v23  ;;  %v66_v27 = vmul.f32 0.03125, %v58_v25 }
  0xac   :  { %v64_v28 = vpop.xlane.xlu1 %63 }
  0xad   :  { %v73_v29 = vmax.f32 %v71_v26, 0.0  ;;  %v70_v30 = vmul.f32 %v66_v27, %v66_v27  ;;  %v68_v31 = vmul.f32 0.03125, %v64_v28  ;;  %v80_v41 = vsub.f32 %v403_v1, %v66_v27 }
  0xaf   :  { %v75_v32 = vadd.f32 1e-05, %v73_v29  ;;  %v72_v33 = vsub.f32 %v68_v31, %v70_v30 }
  0xb1   :  { %284 = vrsqrt.f32 %v75_v32  ;;  %v74_v34 = vmax.f32 %v72_v33, 0.0 }
  0xb3   :  { %v76_v35 = vadd.f32 1e-05, %v74_v34 }
  0xb5   :  { %286 = vrsqrt.f32 %v76_v35 }
  0xbe   :  { %v285_v37 = vpop.eup %284 }
  0xbf   :  { %v81_v39 = vmul.f32 %v285_v37, %v79_v36 }
  0xc1   :  { %v90_v42 = vmul.f32 %v223_v38, %v81_v39 }
  0xc2   :  { %v287_v43 = vpop.eup %286 }
  0xc3   :  { %v82_v44 = vmul.f32 %v287_v43, %v80_v41  ;;  %v99_v45 = vadd.f32 %v224_v40, %v90_v42 }
  0xc5   :  { %v91_v46 = vmul.f32 %v223_v38, %v82_v44  ;;  %276 = vmatprep.mubr.f32.mxu0 %v99_v45 }
  0xc7   :  { %v100_v47 = vadd.f32 %v224_v40, %v91_v46 }
  0xc9   :  { %277 = vmatmul.mubr.f32.vlgmr.msra.gmra.mxu0 %v100_v47 }
 0x189   :  { %v278_v49 = vpop.f32.mrf.mxu0 }
 0x18a   :  { %v200_v50 = vadd.f32 %v278_v49, %v225_v48 }
 0x18b   :  { %v194_v51 = vpop.f32.mrf.mxu0 }
 0x18c   :  { %204 = vst [vmem:[#allocation8 + $0x8] sm:$0xff] %v200_v50  ;;  %v195_v52 = vadd.f32 %v225_v48, %v194_v51 }
 0x18e   :  { %203 = vst [vmem:[#allocation8] sm:$0xff] %v195_v52 }
 0x18f   :  { %339 = shalt.err (!%p336_p0)
}
 0x190   :  { %216 = dma.vmem_to_hbm [thread:$0]  %s211_s9, 256, %s433_s5, [#allocation5], %s355_s21, %s355_s21, %s356_s22  }
 0x191   :  { %352 = dma.done.wait [#allocation5], 256  }
 0x192   :  { %353 = vsyncadd [#allocation5], 4294967040 }
 0x193   :  { %220 = vsyncpa [#allocation4], 1 }
 0x194   :  { %221 = vsyncpa [#allocation7], 1 }
 0x195   :  { %222 = vsyncpa [#allocation5], 1 }

</bundles_post_ra>
